<compile_context>
chip_gen: v6e
topology: v6e:2x2x1
jax: 0.10.0
libtpu: 0.0.40
codegen_flags: <defaults>
</compile_context>

<pallas_src>
import functools

import jax
import jax.numpy as jnp
from jax.experimental import pallas as pl
from jax.experimental.pallas import tpu as pltpu

_EPS = 1e-12  # F.normalize default eps


# --------------------------------------------------------------------------
# Fast path: everything (m, b, features) resident in VMEM, no grid.
# --------------------------------------------------------------------------
def _arnoldi_resident_kernel(m_ref, b_ref, out_ref, *, degree):
    # m_ref: (N, N) native dtype; b_ref: (1, N); out_ref: (degree, N).
    b = b_ref[...].astype(jnp.float32)
    l2 = jnp.sqrt(jnp.sum(b * b))
    v = b * (1.0 / jnp.maximum(l2, _EPS))            # F.normalize(b, dim=0)
    for k in range(degree):                          # static unroll (small degree)
        # w[0, i] = sum_j v[0, j] * m[i, j]  ==  (m @ v) as a row vector.
        # m stays in its native dtype (no per-step N^2 upcast); only the tiny
        # (1, N) vector is cast to the MXU operand dtype. Accumulation is f32.
        w = jax.lax.dot_general(
            v.astype(m_ref.dtype), m_ref[...],
            dimension_numbers=(((1,), (1,)), ((), ())),
            preferred_element_type=jnp.float32)      # (1, N), trans-B matvec
        inf_norm = jnp.max(jnp.abs(w))               # lane/XLU reduce -> scalar
        inv = 1.0 / jnp.maximum(inf_norm, _EPS)      # one scalar reciprocal
        v = w * inv                                  # broadcast multiply
        out_ref[pl.ds(k, 1), :] = v.astype(out_ref.dtype)   # lane-dense row store


# --------------------------------------------------------------------------
# Streaming path: m does not fit VMEM; (tn, N) row-slabs of m are pipelined
# from HBM per degree step. Grid = (degree, N // tn), both axes 'arbitrary'
# (carried state in VMEM scratch).
# --------------------------------------------------------------------------
def _arnoldi_stream_kernel(b_ref, m_ref, out_ref, v_ref, w_ref, mx_ref, *, tn):
    # b_ref: (1, Np) constant block; m_ref: (tn, Np) slab = rows [j*tn,(j+1)*tn)
    # out_ref: (degree, Np) VMEM-resident; v_ref/w_ref: (1, Np) f32 scratch;
    # mx_ref: (1, 1) f32 running inf-norm.
    k = pl.program_id(0)
    j = pl.program_id(1)
    nj = pl.num_programs(1)

    @pl.when((k == 0) & (j == 0))
    def _init():
        bb = b_ref[...].astype(jnp.float32)
        l2 = jnp.sqrt(jnp.sum(bb * bb))
        v_ref[...] = bb * (1.0 / jnp.maximum(l2, _EPS))   # F.normalize(b, dim=0)
        mx_ref[...] = jnp.zeros_like(mx_ref)

    # Partial matvec: output columns [j*tn, (j+1)*tn) of w = m @ v (row vector).
    w_tile = jax.lax.dot_general(
        v_ref[...].astype(m_ref.dtype), m_ref[...],
        dimension_numbers=(((1,), (1,)), ((), ())),
        preferred_element_type=jnp.float32)               # (1, tn)
    off = pl.multiple_of(j * tn, tn)                      # tn is a multiple of 128
    w_ref[:, pl.ds(off, tn)] = w_tile
    mx_ref[...] = jnp.maximum(
        mx_ref[...], jnp.max(jnp.abs(w_tile), axis=(0, 1), keepdims=True))

    @pl.when(j == nj - 1)
    def _finalize():
        # Whole w for this degree step is now in w_ref; normalize once.
        inv = 1.0 / jnp.maximum(mx_ref[...], _EPS)        # (1, 1) scalar recip
        v_new = w_ref[...] * inv                          # broadcast multiply
        v_ref[...] = v_new                                # feed next degree step
        out_ref[pl.ds(k, 1), :] = v_new.astype(out_ref.dtype)
        mx_ref[...] = jnp.zeros_like(mx_ref)


# --------------------------------------------------------------------------
# Wrappers
# --------------------------------------------------------------------------
def _vmem_capacity_bytes():
    try:
        info = pltpu.get_tpu_info()
        cap = getattr(info, "vmem_capacity_bytes", None)
        if cap:
            return int(cap)
    except Exception:
        pass
    return 64 * 1024 * 1024  # conservative (v7x per-TensorCore physical VMEM)


def _arnoldi_resident(m, b, degree, out_dtype, budget):
    N = m.shape[0]
    b_row = b.reshape(1, N)
    need = (N * N * m.dtype.itemsize
            + 2 * N * 4
            + degree * N * jnp.dtype(out_dtype).itemsize)
    vmem_limit = int(min(budget, max(int(1.2 * need) + (1 << 20), 32 << 20)))
    kernel = functools.partial(_arnoldi_resident_kernel, degree=degree)
    feats_t = pl.pallas_call(
        kernel,
        out_shape=jax.ShapeDtypeStruct((degree, N), out_dtype),
        in_specs=[
            pl.BlockSpec(memory_space=pltpu.MemorySpace.VMEM),
            pl.BlockSpec(memory_space=pltpu.MemorySpace.VMEM),
        ],
        out_specs=pl.BlockSpec(memory_space=pltpu.MemorySpace.VMEM),
        compiler_params=pltpu.CompilerParams(vmem_limit_bytes=vmem_limit),
    )(m, b_row)
    return jnp.swapaxes(feats_t, 0, 1)                    # (N, degree)


def _arnoldi_stream(m, b, degree, out_dtype, budget, stream_tile=None):
    N = m.shape[0]
    N_pad = ((N + 127) // 128) * 128
    m_isize = m.dtype.itemsize
    out_isize = jnp.dtype(out_dtype).itemsize

    # Fixed per-call VMEM: b block (x2 buffers), resident output, f32 scratches.
    fixed = (2 * N_pad * b.dtype.itemsize
             + degree * N_pad * out_isize
             + 2 * N_pad * 4 + (2 << 20))

    if stream_tile is not None:
        tn = int(stream_tile)
        assert tn % 128 == 0 and N_pad % tn == 0, "stream_tile must be a 128-multiple dividing padded N"
    else:
        tn = None
        cand = N_pad
        while cand >= 128:
            if N_pad % cand == 0 and 2 * cand * N_pad * m_isize + fixed <= budget:
                tn = cand
                break
            cand -= 128
        if tn is None:
            # TODO(synk): 2-D tiling of m for systems this large.
            raise ValueError(
                f"ArnoldiPreprocessor streaming path: N={N} too large for a "
                f"(128, {N_pad}) double-buffered slab within {budget} VMEM bytes.")

    if N_pad != N:
        # Zero padding is exact: padded rows/cols contribute 0 and cannot
        # change the inf-norm / L2-norm (both are maxima/sums of |.| >= 0).
        m = jnp.pad(m, ((0, N_pad - N), (0, N_pad - N)))
        b = jnp.pad(b, (0, N_pad - N))
    b_row = b.reshape(1, N_pad)
    J = N_pad // tn

    vmem_need = 2 * tn * N_pad * m_isize + fixed
    vmem_limit = int(min(budget, max(int(1.2 * vmem_need), 32 << 20)))

    kernel = functools.partial(_arnoldi_stream_kernel, tn=tn)
    feats_t = pl.pallas_call(
        kernel,
        out_shape=jax.ShapeDtypeStruct((degree, N_pad), out_dtype),
        grid_spec=pltpu.PrefetchScalarGridSpec(
            num_scalar_prefetch=0,
            grid=(degree, J),
            in_specs=[
                pl.BlockSpec((1, N_pad), lambda k, j: (0, 0)),     # b (constant)
                pl.BlockSpec((tn, N_pad), lambda k, j: (j, 0)),    # m row-slab
            ],
            out_specs=pl.BlockSpec((degree, N_pad), lambda k, j: (0, 0)),
            scratch_shapes=[
                pltpu.VMEM((1, N_pad), jnp.float32),   # normalized v (carried)
                pltpu.VMEM((1, N_pad), jnp.float32),   # un-normalized w (current)
                pltpu.VMEM((1, 1), jnp.float32),       # running inf-norm
            ],
        ),
        compiler_params=pltpu.CompilerParams(
            dimension_semantics=("arbitrary", "arbitrary"),
            vmem_limit_bytes=vmem_limit),
    )(b_row, m)
    feats = jnp.swapaxes(feats_t, 0, 1)                    # (N_pad, degree)
    return feats[:N]


def arnoldi_preprocess(m, b, d, degree, *, force_stream=False, stream_tile=None):
    """JAX wrapper mirroring ArnoldiPreprocessor(degree).forward(m, b, d)."""
    del d  # unused by the PyTorch forward
    m = jnp.asarray(m)
    b = jnp.asarray(b)
    N = m.shape[0]
    out_dtype = jnp.result_type(m.dtype, b.dtype)
    if degree == 0:
        # torch.stack([]) would raise in PyTorch; return an empty feature block.
        return jnp.zeros((N, 0), dtype=out_dtype)

    budget = _vmem_capacity_bytes() - (4 << 20)            # leave compiler headroom
    resident_need = int(1.2 * (N * N * m.dtype.itemsize + 2 * N * 4
                               + degree * N * jnp.dtype(out_dtype).itemsize)) + (1 << 20)
    if (not force_stream) and resident_need <= budget:
        return _arnoldi_resident(m, b, degree, out_dtype, budget)
    return _arnoldi_stream(m, b, degree, out_dtype, budget, stream_tile)


def _reference(m, b, degree):
    """Pure-JAX reference matching torch F.normalize semantics."""
    v = b / jnp.maximum(jnp.linalg.norm(b), _EPS)
    feats = []
    for _ in range(degree):
        w = m @ v
        v = w / jnp.maximum(jnp.max(jnp.abs(w)), _EPS)
        feats.append(v)
    return jnp.stack(feats, axis=-1)


if __name__ == "__main__":
    key = jax.random.PRNGKey(0)
    km, kb, kd = jax.random.split(key, 3)

    # Case 1: small system -> fully VMEM-resident fast path.
    N, degree = 128, 8
    m = jax.random.normal(km, (N, N), dtype=jnp.float32)
    b = jax.random.normal(kb, (N,), dtype=jnp.float32)
    d = jax.random.normal(kd, (N,), dtype=jnp.float32)   # unused by forward

    feats = jax.block_until_ready(arnoldi_preprocess(m, b, d, degree))
    ref = _reference(m, b, degree)
    assert feats.shape == (N, degree), feats.shape
    assert jnp.allclose(feats, ref, atol=1e-4, rtol=1e-4), float(
        jnp.max(jnp.abs(feats - ref)))

    # Case 2: exercise the streaming (large-N) path on a small padded problem
    # (N=200 -> padded to 256, tn=128 -> grid=(degree, 2)).
    N2, degree2 = 200, 4
    m2 = jax.random.normal(km, (N2, N2), dtype=jnp.float32)
    b2 = jax.random.normal(kb, (N2,), dtype=jnp.float32)
    feats2 = jax.block_until_ready(
        arnoldi_preprocess(m2, b2, None, degree2, force_stream=True, stream_tile=128))
    ref2 = _reference(m2, b2, degree2)
    assert feats2.shape == (N2, degree2), feats2.shape
    assert jnp.allclose(feats2, ref2, atol=1e-4, rtol=1e-4), float(
        jnp.max(jnp.abs(feats2 - ref2)))

    print("KERNEL_OK")
</pallas_src>

<mosaic_0001>
module attributes {stable_mosaic.version = 11 : i64} {
  func.func @_arnoldi_resident_kernel(%arg0: memref<128x128xf32, #tpu.memory_space<vmem>>, %arg1: memref<1x128xf32, #tpu.memory_space<vmem>>, %arg2: memref<8x128xf32, #tpu.memory_space<vmem>>) attributes {dimension_semantics = [], scalar_prefetch = 0 : i64, scratch_operands = 0 : i64, tpu.core_type = #tpu.core_type<tc>} {
    %c0 = arith.constant 0 : index
    %c0_0 = arith.constant 0 : index
    %0 = vector.load %arg1[%c0, %c0_0] : memref<1x128xf32, #tpu.memory_space<vmem>>, vector<1x128xf32>
    %1 = arith.mulf %0, %0 : vector<1x128xf32>
    %2 = vector.shape_cast %1 : vector<1x128xf32> to vector<1x1x128xf32>
    %cst = arith.constant dense<0.000000e+00> : vector<1xf32>
    %3 = vector.multi_reduction <add>, %2, %cst [1, 2] : vector<1x1x128xf32> to vector<1xf32>
    %4 = vector.shape_cast %3 : vector<1xf32> to vector<1x1x1xf32>
    %5 = vector.extract %4[0, 0, 0] : f32 from vector<1x1x1xf32>
    %6 = math.sqrt %5 : f32
    %cst_1 = arith.constant 9.99999996E-13 : f32
    %7 = arith.maximumf %6, %cst_1 : f32
    %cst_2 = arith.constant 1.000000e+00 : f32
    %8 = arith.divf %cst_2, %7 : f32
    %9 = vector.broadcast %8 : f32 to vector<1x128xf32>
    %10 = arith.mulf %0, %9 : vector<1x128xf32>
    %c0_3 = arith.constant 0 : index
    %c0_4 = arith.constant 0 : index
    %11 = vector.load %arg0[%c0_3, %c0_4] : memref<128x128xf32, #tpu.memory_space<vmem>>, vector<128x128xf32>
    %cst_5 = arith.constant dense<0.000000e+00> : vector<1x128xf32>
    %12 = tpu.matmul %10, %11, %cst_5 {dimension_numbers = #tpu.dot_dimension_numbers<[1], [1], [0], [0], [0, 0, 1, 0], [], []>} : vector<1x128xf32>, vector<128x128xf32>, vector<1x128xf32> -> vector<1x128xf32>
    %13 = math.absf %12 : vector<1x128xf32>
    %14 = vector.shape_cast %13 : vector<1x128xf32> to vector<1x1x128xf32>
    %cst_6 = arith.constant dense<0xFF800000> : vector<1xf32>
    %15 = vector.multi_reduction <maximumf>, %14, %cst_6 [1, 2] : vector<1x1x128xf32> to vector<1xf32>
    %16 = vector.shape_cast %15 : vector<1xf32> to vector<1x1x1xf32>
    %17 = vector.extract %16[0, 0, 0] : f32 from vector<1x1x1xf32>
    %cst_7 = arith.constant 9.99999996E-13 : f32
    %18 = arith.maximumf %17, %cst_7 : f32
    %cst_8 = arith.constant 1.000000e+00 : f32
    %19 = arith.divf %cst_8, %18 : f32
    %20 = vector.broadcast %19 : f32 to vector<1x128xf32>
    %21 = arith.mulf %12, %20 : vector<1x128xf32>
    %c0_9 = arith.constant 0 : index
    %c0_10 = arith.constant 0 : index
    %22 = vector.load %arg2[%c0_9, %c0_10] : memref<8x128xf32, #tpu.memory_space<vmem>>, vector<1x128xf32>
    tpu.vector_store %arg2[%c0_9, %c0_10], %21 {strides = array<i32>} : memref<8x128xf32, #tpu.memory_space<vmem>>, vector<1x128xf32>,
    %c0_11 = arith.constant 0 : index
    %c0_12 = arith.constant 0 : index
    %23 = vector.load %arg0[%c0_11, %c0_12] : memref<128x128xf32, #tpu.memory_space<vmem>>, vector<128x128xf32>
    %cst_13 = arith.constant dense<0.000000e+00> : vector<1x128xf32>
    %24 = tpu.matmul %21, %23, %cst_13 {dimension_numbers = #tpu.dot_dimension_numbers<[1], [1], [0], [0], [0, 0, 1, 0], [], []>} : vector<1x128xf32>, vector<128x128xf32>, vector<1x128xf32> -> vector<1x128xf32>
    %25 = math.absf %24 : vector<1x128xf32>
    %26 = vector.shape_cast %25 : vector<1x128xf32> to vector<1x1x128xf32>
    %cst_14 = arith.constant dense<0xFF800000> : vector<1xf32>
    %27 = vector.multi_reduction <maximumf>, %26, %cst_14 [1, 2] : vector<1x1x128xf32> to vector<1xf32>
    %28 = vector.shape_cast %27 : vector<1xf32> to vector<1x1x1xf32>
    %29 = vector.extract %28[0, 0, 0] : f32 from vector<1x1x1xf32>
    %cst_15 = arith.constant 9.99999996E-13 : f32
    %30 = arith.maximumf %29, %cst_15 : f32
    %cst_16 = arith.constant 1.000000e+00 : f32
    %31 = arith.divf %cst_16, %30 : f32
    %32 = vector.broadcast %31 : f32 to vector<1x128xf32>
    %33 = arith.mulf %24, %32 : vector<1x128xf32>
    %c1 = arith.constant 1 : index
    %c0_17 = arith.constant 0 : index
    %34 = vector.load %arg2[%c1, %c0_17] : memref<8x128xf32, #tpu.memory_space<vmem>>, vector<1x128xf32>
    tpu.vector_store %arg2[%c1, %c0_17], %33 {strides = array<i32>} : memref<8x128xf32, #tpu.memory_space<vmem>>, vector<1x128xf32>,
    %c0_18 = arith.constant 0 : index
    %c0_19 = arith.constant 0 : index
    %35 = vector.load %arg0[%c0_18, %c0_19] : memref<128x128xf32, #tpu.memory_space<vmem>>, vector<128x128xf32>
    %cst_20 = arith.constant dense<0.000000e+00> : vector<1x128xf32>
    %36 = tpu.matmul %33, %35, %cst_20 {dimension_numbers = #tpu.dot_dimension_numbers<[1], [1], [0], [0], [0, 0, 1, 0], [], []>} : vector<1x128xf32>, vector<128x128xf32>, vector<1x128xf32> -> vector<1x128xf32>
    %37 = math.absf %36 : vector<1x128xf32>
    %38 = vector.shape_cast %37 : vector<1x128xf32> to vector<1x1x128xf32>
    %cst_21 = arith.constant dense<0xFF800000> : vector<1xf32>
    %39 = vector.multi_reduction <maximumf>, %38, %cst_21 [1, 2] : vector<1x1x128xf32> to vector<1xf32>
    %40 = vector.shape_cast %39 : vector<1xf32> to vector<1x1x1xf32>
    %41 = vector.extract %40[0, 0, 0] : f32 from vector<1x1x1xf32>
    %cst_22 = arith.constant 9.99999996E-13 : f32
    %42 = arith.maximumf %41, %cst_22 : f32
    %cst_23 = arith.constant 1.000000e+00 : f32
    %43 = arith.divf %cst_23, %42 : f32
    %44 = vector.broadcast %43 : f32 to vector<1x128xf32>
    %45 = arith.mulf %36, %44 : vector<1x128xf32>
    %c2 = arith.constant 2 : index
    %c0_24 = arith.constant 0 : index
    %46 = vector.load %arg2[%c2, %c0_24] : memref<8x128xf32, #tpu.memory_space<vmem>>, vector<1x128xf32>
    tpu.vector_store %arg2[%c2, %c0_24], %45 {strides = array<i32>} : memref<8x128xf32, #tpu.memory_space<vmem>>, vector<1x128xf32>,
    %c0_25 = arith.constant 0 : index
    %c0_26 = arith.constant 0 : index
    %47 = vector.load %arg0[%c0_25, %c0_26] : memref<128x128xf32, #tpu.memory_space<vmem>>, vector<128x128xf32>
    %cst_27 = arith.constant dense<0.000000e+00> : vector<1x128xf32>
    %48 = tpu.matmul %45, %47, %cst_27 {dimension_numbers = #tpu.dot_dimension_numbers<[1], [1], [0], [0], [0, 0, 1, 0], [], []>} : vector<1x128xf32>, vector<128x128xf32>, vector<1x128xf32> -> vector<1x128xf32>
    %49 = math.absf %48 : vector<1x128xf32>
    %50 = vector.shape_cast %49 : vector<1x128xf32> to vector<1x1x128xf32>
    %cst_28 = arith.constant dense<0xFF800000> : vector<1xf32>
    %51 = vector.multi_reduction <maximumf>, %50, %cst_28 [1, 2] : vector<1x1x128xf32> to vector<1xf32>
    %52 = vector.shape_cast %51 : vector<1xf32> to vector<1x1x1xf32>
    %53 = vector.extract %52[0, 0, 0] : f32 from vector<1x1x1xf32>
    %cst_29 = arith.constant 9.99999996E-13 : f32
    %54 = arith.maximumf %53, %cst_29 : f32
    %cst_30 = arith.constant 1.000000e+00 : f32
    %55 = arith.divf %cst_30, %54 : f32
    %56 = vector.broadcast %55 : f32 to vector<1x128xf32>
    %57 = arith.mulf %48, %56 : vector<1x128xf32>
    %c3 = arith.constant 3 : index
    %c0_31 = arith.constant 0 : index
    %58 = vector.load %arg2[%c3, %c0_31] : memref<8x128xf32, #tpu.memory_space<vmem>>, vector<1x128xf32>
    tpu.vector_store %arg2[%c3, %c0_31], %57 {strides = array<i32>} : memref<8x128xf32, #tpu.memory_space<vmem>>, vector<1x128xf32>,
    %c0_32 = arith.constant 0 : index
    %c0_33 = arith.constant 0 : index
    %59 = vector.load %arg0[%c0_32, %c0_33] : memref<128x128xf32, #tpu.memory_space<vmem>>, vector<128x128xf32>
    %cst_34 = arith.constant dense<0.000000e+00> : vector<1x128xf32>
    %60 = tpu.matmul %57, %59, %cst_34 {dimension_numbers = #tpu.dot_dimension_numbers<[1], [1], [0], [0], [0, 0, 1, 0], [], []>} : vector<1x128xf32>, vector<128x128xf32>, vector<1x128xf32> -> vector<1x128xf32>
    %61 = math.absf %60 : vector<1x128xf32>
    %62 = vector.shape_cast %61 : vector<1x128xf32> to vector<1x1x128xf32>
    %cst_35 = arith.constant dense<0xFF800000> : vector<1xf32>
    %63 = vector.multi_reduction <maximumf>, %62, %cst_35 [1, 2] : vector<1x1x128xf32> to vector<1xf32>
    %64 = vector.shape_cast %63 : vector<1xf32> to vector<1x1x1xf32>
    %65 = vector.extract %64[0, 0, 0] : f32 from vector<1x1x1xf32>
    %cst_36 = arith.constant 9.99999996E-13 : f32
    %66 = arith.maximumf %65, %cst_36 : f32
    %cst_37 = arith.constant 1.000000e+00 : f32
    %67 = arith.divf %cst_37, %66 : f32
    %68 = vector.broadcast %67 : f32 to vector<1x128xf32>
    %69 = arith.mulf %60, %68 : vector<1x128xf32>
    %c4 = arith.constant 4 : index
    %c0_38 = arith.constant 0 : index
    %70 = vector.load %arg2[%c4, %c0_38] : memref<8x128xf32, #tpu.memory_space<vmem>>, vector<1x128xf32>
    tpu.vector_store %arg2[%c4, %c0_38], %69 {strides = array<i32>} : memref<8x128xf32, #tpu.memory_space<vmem>>, vector<1x128xf32>,
    %c0_39 = arith.constant 0 : index
    %c0_40 = arith.constant 0 : index
    %71 = vector.load %arg0[%c0_39, %c0_40] : memref<128x128xf32, #tpu.memory_space<vmem>>, vector<128x128xf32>
    %cst_41 = arith.constant dense<0.000000e+00> : vector<1x128xf32>
    %72 = tpu.matmul %69, %71, %cst_41 {dimension_numbers = #tpu.dot_dimension_numbers<[1], [1], [0], [0], [0, 0, 1, 0], [], []>} : vector<1x128xf32>, vector<128x128xf32>, vector<1x128xf32> -> vector<1x128xf32>
    %73 = math.absf %72 : vector<1x128xf32>
    %74 = vector.shape_cast %73 : vector<1x128xf32> to vector<1x1x128xf32>
    %cst_42 = arith.constant dense<0xFF800000> : vector<1xf32>
    %75 = vector.multi_reduction <maximumf>, %74, %cst_42 [1, 2] : vector<1x1x128xf32> to vector<1xf32>
    %76 = vector.shape_cast %75 : vector<1xf32> to vector<1x1x1xf32>
    %77 = vector.extract %76[0, 0, 0] : f32 from vector<1x1x1xf32>
    %cst_43 = arith.constant 9.99999996E-13 : f32
    %78 = arith.maximumf %77, %cst_43 : f32
    %cst_44 = arith.constant 1.000000e+00 : f32
    %79 = arith.divf %cst_44, %78 : f32
    %80 = vector.broadcast %79 : f32 to vector<1x128xf32>
    %81 = arith.mulf %72, %80 : vector<1x128xf32>
    %c5 = arith.constant 5 : index
    %c0_45 = arith.constant 0 : index
    %82 = vector.load %arg2[%c5, %c0_45] : memref<8x128xf32, #tpu.memory_space<vmem>>, vector<1x128xf32>
    tpu.vector_store %arg2[%c5, %c0_45], %81 {strides = array<i32>} : memref<8x128xf32, #tpu.memory_space<vmem>>, vector<1x128xf32>,
    %c0_46 = arith.constant 0 : index
    %c0_47 = arith.constant 0 : index
    %83 = vector.load %arg0[%c0_46, %c0_47] : memref<128x128xf32, #tpu.memory_space<vmem>>, vector<128x128xf32>
    %cst_48 = arith.constant dense<0.000000e+00> : vector<1x128xf32>
    %84 = tpu.matmul %81, %83, %cst_48 {dimension_numbers = #tpu.dot_dimension_numbers<[1], [1], [0], [0], [0, 0, 1, 0], [], []>} : vector<1x128xf32>, vector<128x128xf32>, vector<1x128xf32> -> vector<1x128xf32>
    %85 = math.absf %84 : vector<1x128xf32>
    %86 = vector.shape_cast %85 : vector<1x128xf32> to vector<1x1x128xf32>
    %cst_49 = arith.constant dense<0xFF800000> : vector<1xf32>
    %87 = vector.multi_reduction <maximumf>, %86, %cst_49 [1, 2] : vector<1x1x128xf32> to vector<1xf32>
    %88 = vector.shape_cast %87 : vector<1xf32> to vector<1x1x1xf32>
    %89 = vector.extract %88[0, 0, 0] : f32 from vector<1x1x1xf32>
    %cst_50 = arith.constant 9.99999996E-13 : f32
    %90 = arith.maximumf %89, %cst_50 : f32
    %cst_51 = arith.constant 1.000000e+00 : f32
    %91 = arith.divf %cst_51, %90 : f32
    %92 = vector.broadcast %91 : f32 to vector<1x128xf32>
    %93 = arith.mulf %84, %92 : vector<1x128xf32>
    %c6 = arith.constant 6 : index
    %c0_52 = arith.constant 0 : index
    %94 = vector.load %arg2[%c6, %c0_52] : memref<8x128xf32, #tpu.memory_space<vmem>>, vector<1x128xf32>
    tpu.vector_store %arg2[%c6, %c0_52], %93 {strides = array<i32>} : memref<8x128xf32, #tpu.memory_space<vmem>>, vector<1x128xf32>,
    %c0_53 = arith.constant 0 : index
    %c0_54 = arith.constant 0 : index
    %95 = vector.load %arg0[%c0_53, %c0_54] : memref<128x128xf32, #tpu.memory_space<vmem>>, vector<128x128xf32>
    %cst_55 = arith.constant dense<0.000000e+00> : vector<1x128xf32>
    %96 = tpu.matmul %93, %95, %cst_55 {dimension_numbers = #tpu.dot_dimension_numbers<[1], [1], [0], [0], [0, 0, 1, 0], [], []>} : vector<1x128xf32>, vector<128x128xf32>, vector<1x128xf32> -> vector<1x128xf32>
    %97 = math.absf %96 : vector<1x128xf32>
    %98 = vector.shape_cast %97 : vector<1x128xf32> to vector<1x1x128xf32>
    %cst_56 = arith.constant dense<0xFF800000> : vector<1xf32>
    %99 = vector.multi_reduction <maximumf>, %98, %cst_56 [1, 2] : vector<1x1x128xf32> to vector<1xf32>
    %100 = vector.shape_cast %99 : vector<1xf32> to vector<1x1x1xf32>
    %101 = vector.extract %100[0, 0, 0] : f32 from vector<1x1x1xf32>
    %cst_57 = arith.constant 9.99999996E-13 : f32
    %102 = arith.maximumf %101, %cst_57 : f32
    %cst_58 = arith.constant 1.000000e+00 : f32
    %103 = arith.divf %cst_58, %102 : f32
    %104 = vector.broadcast %103 : f32 to vector<1x128xf32>
    %105 = arith.mulf %96, %104 : vector<1x128xf32>
    %c7 = arith.constant 7 : index
    %c0_59 = arith.constant 0 : index
    %106 = vector.load %arg2[%c7, %c0_59] : memref<8x128xf32, #tpu.memory_space<vmem>>, vector<1x128xf32>
    tpu.vector_store %arg2[%c7, %c0_59], %105 {strides = array<i32>} : memref<8x128xf32, #tpu.memory_space<vmem>>, vector<1x128xf32>,
    return
  }
}

</mosaic_0001>

<bundles_post_ra>
// kernel: tpu_custom_call.1
= control target key start
LH: loop header
LB: loop body
LE: loop exit
PB: predicated region body
PF: predicated region fallthrough
CT: control target
= control target key end

     0   :  { %7 = vsyncpa [#allocation3], 0  ;;  %s1784_s0 = inlined_call_operand.hbm [shape: f32[128,128], index: 0, kind: input, shape index: {}]   ;;  %s1785_s1 = inlined_call_operand.vmem [shape: f32[1,128], index: 1, kind: input, shape index: {}]   ;;  %s1786_s2 = inlined_call_operand.hbm [shape: f32[8,128], index: 2, kind: output, shape index: {}]  }
   0x1   :  { %8 = vsyncpa [#allocation4], 0  ;;  %s1426_s9 = smov [#allocation2]  }
   0x2   :  { %s14_s10 = sshll.u32 %s1426_s9, 4  ;;  %s15_s10 = int_to_ptr.vmem [resolvable:$true] %s14_s10 }
   0x3   :  { %s1390_s11 = scalar_lea.vmem %s15_s10, 2048  ;;  %p1395_p1 = scmp.lt.s32.totalorder %s15_s10, %s15_s10 }
   0x4   :  { %p1391_p0 = scmp.ne.s32.totalorder %s15_s10, %s1390_s11  ;;  %p1396_p2 = scmp.lt.s32.totalorder %s1390_s11, %s1390_s11 }
   0x6   :  { %p1397_p3 = por %p1396_p2, %p1395_p1 }
   0x8   :  { %p1398_p4 = pnand %p1397_p3, %p1391_p0 }
   0xa   :  { %1401 = shalt.err (!%p1398_p4)
}
   0xb   :  { %s1427_s12 = smov 128   ;;  %s1428_s13 = smov 8  }
   0xc   :  { %20 = dma.hbm_to_vmem [thread:$0]  %s1784_s0, 2048, %s15_s10, [#allocation3], %s1427_s12, %s1427_s12, %s1428_s13  }
   0xd   :  { %1422 = dma.done.wait [#allocation3], 2048  }
   0xe   :  { %1423 = vsyncadd [#allocation3], 4294965248  ;;  %v1454_v0 = vld [vmem:[%s1785_s1] sm:$0x1]  ;;  %vm28_vm0 = vcmask 1040384   ;;  %v1459_v7 = vld [vmem:[#allocation2 + $0x78] sm:$0xff] }
   0xf   :  { %v27_v1 = vmul.f32 %v1454_v0, %v1454_v0  ;;  %v1429_v9 = vmov 0.0   ;;  %v1466_v11 = vld [vmem:[#allocation2 + $0x70] sm:$0xff]  ;;  %v1472_v13 = vld [vmem:[#allocation2 + $0x68] sm:$0xff]  ;;  %v1479_v14 = vld [vmem:[#allocation2 + $0x60] sm:$0xff]  ;;  %vm1430_vm1 = vmmov 0   ;;  %s1432_s16 = smov [#allocation5]  }
  0x10   :  { %1037 = vmatprep.subr.mxu0 %v1429_v9  ;;  %1072 = vmatprep.subr.mxu1 %v1429_v9  ;;  %v1484_v15 = vld [vmem:[#allocation2 + $0x58] sm:$0xff]  ;;  %v1490_v16 = vld [vmem:[#allocation2 + $0x50] sm:$0xff]  ;;  %v1496_v17 = vld [vmem:[#allocation2 + $0x48] sm:$0xff]  ;;  %s1431_s18 = smov 1e-12   ;;  %s892_s17 = sshll.u32 %s1432_s16, 4  ;;  %s893_s17 = int_to_ptr.vmem [resolvable:$true] %s892_s17 }
  0x11   :  { %v29_v2 = vsel %vm28_vm0, %v27_v1, 0.0  ;;  %1038 = vmatpush3.xpose.msra.mxu0 %v1459_v7  ;;  %1073 = vmatpush3.xpose.msra.mxu1 %v1459_v7  ;;  %v1502_v18 = vld [vmem:[#allocation2 + $0x40] sm:$0xff]  ;;  %v1508_v19 = vld [vmem:[#allocation2 + $0x38] sm:$0xff]  ;;  %v1514_v20 = vld [vmem:[#allocation2 + $0x30] sm:$0xff]  ;;  %p1407_p6 = scmp.lt.s32.totalorder %s893_s17, %s893_s17 }
  0x12   :  { %30 = vadd.xlane.f32.xlu0 %v29_v2  ;;  %1039 = vmatprep.subr.mxu0 %v1429_v9  ;;  %v1520_v21 = vld [vmem:[#allocation2 + $0x28] sm:$0xff]  ;;  %v1526_v22 = vld [vmem:[#allocation2 + $0x20] sm:$0xff]  ;;  %v1532_v23 = vld [vmem:[#allocation2 + $0x18] sm:$0xff] }
  0x13   :  { %1074 = vmatprep.subr.mxu1 %v1429_v9  ;;  %v1538_v24 = vld [vmem:[#allocation2 + $0x10] sm:$0xff]  ;;  %v1544_v25 = vld [vmem:[#allocation2 + $0x8] sm:$0xff]  ;;  %v1551_v27 = vld [vmem:[#allocation2] sm:$0xff]  ;;  %1069 = vmatprep.mubr.msk.f32.mxu0 %vm1430_vm1, %v1429_v9 }
  0x14   :  { %1104 = vmatprep.mubr.msk.f32.mxu1 %vm1430_vm1, %v1429_v9 }
  0x15   :  { %1040 = vmatpush3.xpose.msra.mxu0 %v1466_v11  ;;  %1075 = vmatpush3.xpose.msra.mxu1 %v1466_v11 }
  0x16   :  { %1041 = vmatprep.subr.mxu0 %v1429_v9  ;;  %1076 = vmatprep.subr.mxu1 %v1429_v9 }
  0x19   :  { %1042 = vmatpush3.xpose.msra.mxu0 %v1472_v13  ;;  %1077 = vmatpush3.xpose.msra.mxu1 %v1472_v13 }
  0x1a   :  { %1043 = vmatprep.subr.mxu0 %v1429_v9  ;;  %1078 = vmatprep.subr.mxu1 %v1429_v9 }
  0x1d   :  { %1044 = vmatpush3.xpose.msra.mxu0 %v1479_v14  ;;  %1079 = vmatpush3.xpose.msra.mxu1 %v1479_v14 }
  0x1e   :  { %1045 = vmatprep.subr.mxu0 %v1429_v9  ;;  %1080 = vmatprep.subr.mxu1 %v1429_v9 }
  0x21   :  { %1046 = vmatpush3.xpose.msra.mxu0 %v1484_v15  ;;  %1081 = vmatpush3.xpose.msra.mxu1 %v1484_v15 }
  0x22   :  { %1047 = vmatprep.subr.mxu0 %v1429_v9  ;;  %1082 = vmatprep.subr.mxu1 %v1429_v9 }
  0x25   :  { %1048 = vmatpush3.xpose.msra.mxu0 %v1490_v16  ;;  %1083 = vmatpush3.xpose.msra.mxu1 %v1490_v16 }
  0x26   :  { %1049 = vmatprep.subr.mxu0 %v1429_v9  ;;  %1084 = vmatprep.subr.mxu1 %v1429_v9 }
  0x29   :  { %1050 = vmatpush3.xpose.msra.mxu0 %v1496_v17  ;;  %1085 = vmatpush3.xpose.msra.mxu1 %v1496_v17 }
  0x2a   :  { %1051 = vmatprep.subr.mxu0 %v1429_v9  ;;  %1086 = vmatprep.subr.mxu1 %v1429_v9 }
  0x2d   :  { %1052 = vmatpush3.xpose.msra.mxu0 %v1502_v18  ;;  %1087 = vmatpush3.xpose.msra.mxu1 %v1502_v18 }
  0x2e   :  { %1053 = vmatprep.subr.mxu0 %v1429_v9  ;;  %1088 = vmatprep.subr.mxu1 %v1429_v9 }
  0x31   :  { %1054 = vmatpush3.xpose.msra.mxu0 %v1508_v19  ;;  %1089 = vmatpush3.xpose.msra.mxu1 %v1508_v19 }
  0x32   :  { %1055 = vmatprep.subr.mxu0 %v1429_v9  ;;  %1090 = vmatprep.subr.mxu1 %v1429_v9 }
  0x35   :  { %1056 = vmatpush3.xpose.msra.mxu0 %v1514_v20  ;;  %1091 = vmatpush3.xpose.msra.mxu1 %v1514_v20 }
  0x36   :  { %1057 = vmatprep.subr.mxu0 %v1429_v9  ;;  %1092 = vmatprep.subr.mxu1 %v1429_v9 }
  0x39   :  { %1058 = vmatpush3.xpose.msra.mxu0 %v1520_v21  ;;  %1093 = vmatpush3.xpose.msra.mxu1 %v1520_v21 }
  0x3a   :  { %1059 = vmatprep.subr.mxu0 %v1429_v9  ;;  %1094 = vmatprep.subr.mxu1 %v1429_v9 }
  0x3d   :  { %1060 = vmatpush3.xpose.msra.mxu0 %v1526_v22  ;;  %1095 = vmatpush3.xpose.msra.mxu1 %v1526_v22 }
  0x3e   :  { %1061 = vmatprep.subr.mxu0 %v1429_v9  ;;  %1096 = vmatprep.subr.mxu1 %v1429_v9 }
  0x41   :  { %1062 = vmatpush3.xpose.msra.mxu0 %v1532_v23  ;;  %1097 = vmatpush3.xpose.msra.mxu1 %v1532_v23 }
  0x42   :  { %1063 = vmatprep.subr.mxu0 %v1429_v9  ;;  %1098 = vmatprep.subr.mxu1 %v1429_v9 }
  0x45   :  { %1064 = vmatpush3.xpose.msra.mxu0 %v1538_v24  ;;  %1099 = vmatpush3.xpose.msra.mxu1 %v1538_v24 }
  0x46   :  { %1065 = vmatprep.subr.mxu0 %v1429_v9  ;;  %1100 = vmatprep.subr.mxu1 %v1429_v9 }
  0x49   :  { %1066 = vmatpush3.xpose.msra.mxu0 %v1544_v25  ;;  %1101 = vmatpush3.xpose.msra.mxu1 %v1544_v25 }
  0x4a   :  { %1067 = vmatprep.subr.mxu0 %v1429_v9  ;;  %1102 = vmatprep.subr.mxu1 %v1429_v9 }
  0x4d   :  { %1068 = vmatpush3.xpose.msra.mxu0 %v1551_v27  ;;  %1103 = vmatpush3.xpose.msra.mxu1 %v1551_v27 }
  0x4e   :  { %1107 = vmatprep.subr.mxu0 %v1429_v9  ;;  %1142 = vmatprep.subr.mxu1 %v1429_v9 }
  0x9b   :  { %v31_v3 = vpop.xlane.xlu0 %30 }
  0x9c   :  { %v32_v4 = vrot.slane %v31_v3, 4 }
  0x9e   :  { %v33_v5 = vadd.f32 %v32_v4, %v31_v3 }
  0xa0   :  { %v34_v6 = vrot.slane %v33_v5, 2 }
  0xa2   :  { %v35_v8 = vadd.f32 %v34_v6, %v33_v5 }
  0xa4   :  { %v36_v10 = vrot.slane %v35_v8, 1 }
  0xa6   :  { %v37_v12 = vadd.f32 %v36_v10, %v35_v8 }
  0xa8   :  { %1317 = vpush %v37_v12 }
  0xd9   :  { %s1318_s0 = spop %1317 }
  0xda   :  { %v39_v26 = vstv %s1318_s0 }
  0xdb   :  { %1362 = vrsqrt.f32 %v39_v26  ;;  %vm42_vm2 = vcmp.eq.f32.partialorder %v39_v26, inf  ;;  %v45_v30 = vand.u32 2147483648, %v39_v26  ;;  %vm44_vm3 = vcmp.eq.f32.partialorder %v39_v26, 0.0 }
  0xe8   :  { %v1363_v28 = vpop.eup %1362 }
  0xe9   :  { %v41_v29 = vmul.f32 %v1363_v28, %v39_v26 }
  0xeb   :  { %v43_v31 = vsel %vm42_vm2, %v39_v26, %v41_v29 }
  0xec   :  { %v46_v32 = vsel %vm44_vm3, %v45_v30, %v43_v31 }
  0xed   :  { %1319 = vpush %v46_v32 }
 0x11e   :  { %s1320_s1 = spop %1319 }
 0x11f   :  { %s48_s19 = smax.f32 %s1431_s18, %s1320_s1  ;;  %s1402_s1 = scalar_lea.vmem %s893_s17, 128 }
 0x120   :  { %v49_v33 = vstv %s48_s19  ;;  %p1403_p5 = scmp.ne.s32.totalorder %s893_s17, %s1402_s1  ;;  %p1408_p7 = scmp.lt.s32.totalorder %s1402_s1, %s1402_s1 }
 0x121   :  { %1364 = vrcp.f32 %v49_v33 }
 0x122   :  { %p1409_p8 = por %p1408_p7, %p1407_p6 }
 0x124   :  { %p1410_p9 = pnand %p1409_p8, %p1403_p5 }
 0x12e   :  { %v1365_v34 = vpop.eup %1364 }
 0x12f   :  { %1321 = vpush %v1365_v34 }
 0x160   :  { %s1322_s20 = spop %1321 }
 0x161   :  { %v52_v35 = vstv %s1322_s20 }
 0x162   :  { %v53_v36 = vmul.f32 %v52_v35, %v1454_v0 }
 0x164   :  { %1070 = vmatmul.mubr.f32.vlgmr.msra.gmra.mxu0 %v53_v36 }
 0x165   :  { %1108 = vmatpush3.xpose.msra.mxu0 %v1459_v7  ;;  %1139 = vmatprep.mubr.msk.f32.mxu0 %vm1430_vm1, %v1429_v9 }
 0x166   :  { %1109 = vmatprep.subr.mxu0 %v1429_v9 }
 0x169   :  { %1110 = vmatpush3.xpose.msra.mxu0 %v1466_v11 }
 0x16a   :  { %1111 = vmatprep.subr.mxu0 %v1429_v9 }
 0x16d   :  { %1112 = vmatpush3.xpose.msra.mxu0 %v1472_v13 }
 0x16e   :  { %1113 = vmatprep.subr.mxu0 %v1429_v9 }
 0x171   :  { %1114 = vmatpush3.xpose.msra.mxu0 %v1479_v14 }
 0x172   :  { %1115 = vmatprep.subr.mxu0 %v1429_v9 }
 0x175   :  { %1116 = vmatpush3.xpose.msra.mxu0 %v1484_v15 }
 0x176   :  { %1117 = vmatprep.subr.mxu0 %v1429_v9 }
 0x179   :  { %1118 = vmatpush3.xpose.msra.mxu0 %v1490_v16 }
 0x17a   :  { %1119 = vmatprep.subr.mxu0 %v1429_v9 }
 0x17d   :  { %1120 = vmatpush3.xpose.msra.mxu0 %v1496_v17 }
 0x17e   :  { %1121 = vmatprep.subr.mxu0 %v1429_v9 }
 0x181   :  { %1122 = vmatpush3.xpose.msra.mxu0 %v1502_v18 }
 0x182   :  { %1123 = vmatprep.subr.mxu0 %v1429_v9 }
 0x185   :  { %1124 = vmatpush3.xpose.msra.mxu0 %v1508_v19 }
 0x186   :  { %1125 = vmatprep.subr.mxu0 %v1429_v9 }
 0x189   :  { %1126 = vmatpush3.xpose.msra.mxu0 %v1514_v20 }
 0x18a   :  { %1127 = vmatprep.subr.mxu0 %v1429_v9 }
 0x18d   :  { %1128 = vmatpush3.xpose.msra.mxu0 %v1520_v21 }
 0x18e   :  { %1129 = vmatprep.subr.mxu0 %v1429_v9 }
 0x191   :  { %1130 = vmatpush3.xpose.msra.mxu0 %v1526_v22 }
 0x192   :  { %1131 = vmatprep.subr.mxu0 %v1429_v9 }
 0x195   :  { %1132 = vmatpush3.xpose.msra.mxu0 %v1532_v23 }
 0x196   :  { %1133 = vmatprep.subr.mxu0 %v1429_v9 }
 0x199   :  { %1134 = vmatpush3.xpose.msra.mxu0 %v1538_v24 }
 0x19a   :  { %1135 = vmatprep.subr.mxu0 %v1429_v9 }
 0x19d   :  { %1136 = vmatpush3.xpose.msra.mxu0 %v1544_v25 }
 0x19e   :  { %1137 = vmatprep.subr.mxu0 %v1429_v9 }
 0x1a1   :  { %1138 = vmatpush3.xpose.msra.mxu0 %v1551_v27 }
 0x1a2   :  { %1177 = vmatprep.subr.mxu0 %v1429_v9 }
 0x224   :  { %v136_v37 = vpop.f32.mrf.mxu0 }
 0x225   :  { %v140_v38 = vand.u32 2147483647, %v136_v37 }
 0x226   :  { %v1071_v39 = vpop.f32.mrf.mxu0 }
 0x227   :  { %v141_v40 = vsel %vm28_vm0, %v140_v38, -inf }
 0x228   :  { %142 = vmax.xlane.f32.xlu0 %v141_v40 }
 0x2b1   :  { %v143_v41 = vpop.xlane.xlu0 %142 }
 0x2b2   :  { %v144_v42 = vrot.slane %v143_v41, 4 }
 0x2b4   :  { %v145_v43 = vmax.f32 %v143_v41, %v144_v42 }
 0x2b6   :  { %v146_v44 = vrot.slane %v145_v43, 2 }
 0x2b8   :  { %v147_v45 = vmax.f32 %v145_v43, %v146_v44 }
 0x2ba   :  { %v148_v46 = vrot.slane %v147_v45, 1 }
 0x2bc   :  { %v149_v47 = vmax.f32 %v147_v45, %v148_v46 }
 0x2be   :  { %1323 = vpush %v149_v47 }
 0x2ef   :  { %s1324_s21 = spop %1323 }
 0x2f0   :  { %s151_s22 = smax.f32 %s1431_s18, %s1324_s21 }
 0x2f1   :  { %v152_v48 = vstv %s151_s22 }
 0x2f2   :  { %1366 = vrcp.f32 %v152_v48 }
 0x2ff   :  { %v1367_v49 = vpop.eup %1366 }
 0x300   :  { %1325 = vpush %v1367_v49 }
 0x331   :  { %s1326_s23 = spop %1325 }
 0x332   :  { %v155_v50 = vstv %s1326_s23 }
 0x333   :  { %v156_v51 = vmul.f32 %v155_v50, %v136_v37 }
 0x335   :  { %157 = vst [vmem:[#allocation5] sm:$0x1] %v156_v51  ;;  %1105 = vmatmul.mubr.f32.vlgmr.msra.gmra.mxu1 %v156_v51 }
 0x336   :  { %1143 = vmatpush3.xpose.msra.mxu1 %v1459_v7  ;;  %1174 = vmatprep.mubr.msk.f32.mxu1 %vm1430_vm1, %v1429_v9 }
 0x337   :  { %1144 = vmatprep.subr.mxu1 %v1429_v9 }
 0x33a   :  { %1145 = vmatpush3.xpose.msra.mxu1 %v1466_v11 }
 0x33b   :  { %1146 = vmatprep.subr.mxu1 %v1429_v9 }
 0x33e   :  { %1147 = vmatpush3.xpose.msra.mxu1 %v1472_v13 }
 0x33f   :  { %1148 = vmatprep.subr.mxu1 %v1429_v9 }
 0x342   :  { %1149 = vmatpush3.xpose.msra.mxu1 %v1479_v14 }
 0x343   :  { %1150 = vmatprep.subr.mxu1 %v1429_v9 }
 0x346   :  { %1151 = vmatpush3.xpose.msra.mxu1 %v1484_v15 }
 0x347   :  { %1152 = vmatprep.subr.mxu1 %v1429_v9 }
 0x34a   :  { %1153 = vmatpush3.xpose.msra.mxu1 %v1490_v16 }
 0x34b   :  { %1154 = vmatprep.subr.mxu1 %v1429_v9 }
 0x34e   :  { %1155 = vmatpush3.xpose.msra.mxu1 %v1496_v17 }
 0x34f   :  { %1156 = vmatprep.subr.mxu1 %v1429_v9 }
 0x352   :  { %1157 = vmatpush3.xpose.msra.mxu1 %v1502_v18 }
 0x353   :  { %1158 = vmatprep.subr.mxu1 %v1429_v9 }
 0x356   :  { %1159 = vmatpush3.xpose.msra.mxu1 %v1508_v19 }
 0x357   :  { %1160 = vmatprep.subr.mxu1 %v1429_v9 }
 0x35a   :  { %1161 = vmatpush3.xpose.msra.mxu1 %v1514_v20 }
 0x35b   :  { %1162 = vmatprep.subr.mxu1 %v1429_v9 }
 0x35e   :  { %1163 = vmatpush3.xpose.msra.mxu1 %v1520_v21 }
 0x35f   :  { %1164 = vmatprep.subr.mxu1 %v1429_v9 }
 0x362   :  { %1165 = vmatpush3.xpose.msra.mxu1 %v1526_v22 }
 0x363   :  { %1166 = vmatprep.subr.mxu1 %v1429_v9 }
 0x366   :  { %1167 = vmatpush3.xpose.msra.mxu1 %v1532_v23 }
 0x367   :  { %1168 = vmatprep.subr.mxu1 %v1429_v9 }
 0x36a   :  { %1169 = vmatpush3.xpose.msra.mxu1 %v1538_v24 }
 0x36b   :  { %1170 = vmatprep.subr.mxu1 %v1429_v9 }
 0x36e   :  { %1171 = vmatpush3.xpose.msra.mxu1 %v1544_v25 }
 0x36f   :  { %1172 = vmatprep.subr.mxu1 %v1429_v9 }
 0x372   :  { %1173 = vmatpush3.xpose.msra.mxu1 %v1551_v27 }
 0x373   :  { %1212 = vmatprep.subr.mxu1 %v1429_v9 }
 0x3f5   :  { %v240_v52 = vpop.f32.mrf.mxu1 }
 0x3f6   :  { %v244_v53 = vand.u32 2147483647, %v240_v52 }
 0x3f7   :  { %v1106_v54 = vpop.f32.mrf.mxu1 }
 0x3f8   :  { %v245_v55 = vsel %vm28_vm0, %v244_v53, -inf }
 0x3f9   :  { %246 = vmax.xlane.f32.xlu1 %v245_v55 }
 0x482   :  { %v247_v56 = vpop.xlane.xlu1 %246 }
 0x483   :  { %v248_v57 = vrot.slane %v247_v56, 4 }
 0x485   :  { %v249_v58 = vmax.f32 %v247_v56, %v248_v57 }
 0x487   :  { %v250_v59 = vrot.slane %v249_v58, 2 }
 0x489   :  { %v251_v60 = vmax.f32 %v249_v58, %v250_v59 }
 0x48b   :  { %v252_v61 = vrot.slane %v251_v60, 1 }
 0x48d   :  { %v253_v62 = vmax.f32 %v251_v60, %v252_v61 }
 0x48f   :  { %1327 = vpush %v253_v62 }
 0x4c0   :  { %s1328_s24 = spop %1327 }
 0x4c1   :  { %s255_s25 = smax.f32 %s1431_s18, %s1328_s24 }
 0x4c2   :  { %v256_v63 = vstv %s255_s25 }
 0x4c3   :  { %1368 = vrcp.f32 %v256_v63 }
 0x4d0   :  { %v1369_v0 = vpop.eup %1368 }
 0x4d1   :  { %1329 = vpush %v1369_v0 }
 0x502   :  { %s1330_s26 = spop %1329 }
 0x503   :  { %v259_v1 = vstv %s1330_s26 }
 0x504   :  { %v260_v2 = vmul.f32 %v259_v1, %v240_v52 }
 0x506   :  { %261 = vst [vmem:[#allocation5 + $0x1] sm:$0x1] %v260_v2  ;;  %1140 = vmatmul.mubr.f32.vlgmr.msra.gmra.mxu0 %v260_v2 }
 0x507   :  { %1178 = vmatpush3.xpose.msra.mxu0 %v1459_v7  ;;  %1209 = vmatprep.mubr.msk.f32.mxu0 %vm1430_vm1, %v1429_v9 }
 0x508   :  { %1179 = vmatprep.subr.mxu0 %v1429_v9 }
 0x50b   :  { %1180 = vmatpush3.xpose.msra.mxu0 %v1466_v11 }
 0x50c   :  { %1181 = vmatprep.subr.mxu0 %v1429_v9 }
 0x50f   :  { %1182 = vmatpush3.xpose.msra.mxu0 %v1472_v13 }
 0x510   :  { %1183 = vmatprep.subr.mxu0 %v1429_v9 }
 0x513   :  { %1184 = vmatpush3.xpose.msra.mxu0 %v1479_v14 }
 0x514   :  { %1185 = vmatprep.subr.mxu0 %v1429_v9 }
 0x517   :  { %1186 = vmatpush3.xpose.msra.mxu0 %v1484_v15 }
 0x518   :  { %1187 = vmatprep.subr.mxu0 %v1429_v9 }
 0x51b   :  { %1188 = vmatpush3.xpose.msra.mxu0 %v1490_v16 }
 0x51c   :  { %1189 = vmatprep.subr.mxu0 %v1429_v9 }
 0x51f   :  { %1190 = vmatpush3.xpose.msra.mxu0 %v1496_v17 }
 0x520   :  { %1191 = vmatprep.subr.mxu0 %v1429_v9 }
 0x523   :  { %1192 = vmatpush3.xpose.msra.mxu0 %v1502_v18 }
 0x524   :  { %1193 = vmatprep.subr.mxu0 %v1429_v9 }
 0x527   :  { %1194 = vmatpush3.xpose.msra.mxu0 %v1508_v19 }
 0x528   :  { %1195 = vmatprep.subr.mxu0 %v1429_v9 }
 0x52b   :  { %1196 = vmatpush3.xpose.msra.mxu0 %v1514_v20 }
 0x52c   :  { %1197 = vmatprep.subr.mxu0 %v1429_v9 }
 0x52f   :  { %1198 = vmatpush3.xpose.msra.mxu0 %v1520_v21 }
 0x530   :  { %1199 = vmatprep.subr.mxu0 %v1429_v9 }
 0x533   :  { %1200 = vmatpush3.xpose.msra.mxu0 %v1526_v22 }
 0x534   :  { %1201 = vmatprep.subr.mxu0 %v1429_v9 }
 0x537   :  { %1202 = vmatpush3.xpose.msra.mxu0 %v1532_v23 }
 0x538   :  { %1203 = vmatprep.subr.mxu0 %v1429_v9 }
 0x53b   :  { %1204 = vmatpush3.xpose.msra.mxu0 %v1538_v24 }
 0x53c   :  { %1205 = vmatprep.subr.mxu0 %v1429_v9 }
 0x53f   :  { %1206 = vmatpush3.xpose.msra.mxu0 %v1544_v25 }
 0x540   :  { %1207 = vmatprep.subr.mxu0 %v1429_v9 }
 0x543   :  { %1208 = vmatpush3.xpose.msra.mxu0 %v1551_v27 }
 0x544   :  { %1247 = vmatprep.subr.mxu0 %v1429_v9 }
 0x5c6   :  { %v344_v3 = vpop.f32.mrf.mxu0 }
 0x5c7   :  { %v348_v4 = vand.u32 2147483647, %v344_v3 }
 0x5c8   :  { %v1141_v5 = vpop.f32.mrf.mxu0 }
 0x5c9   :  { %v349_v6 = vsel %vm28_vm0, %v348_v4, -inf }
 0x5ca   :  { %350 = vmax.xlane.f32.xlu1 %v349_v6 }
 0x653   :  { %v351_v8 = vpop.xlane.xlu1 %350 }
 0x654   :  { %v352_v10 = vrot.slane %v351_v8, 4 }
 0x656   :  { %v353_v12 = vmax.f32 %v351_v8, %v352_v10 }
 0x658   :  { %v354_v26 = vrot.slane %v353_v12, 2 }
 0x65a   :  { %v355_v28 = vmax.f32 %v353_v12, %v354_v26 }
 0x65c   :  { %v356_v29 = vrot.slane %v355_v28, 1 }
 0x65e   :  { %v357_v30 = vmax.f32 %v355_v28, %v356_v29 }
 0x660   :  { %1331 = vpush %v357_v30 }
 0x691   :  { %s1332_s27 = spop %1331 }
 0x692   :  { %s359_s28 = smax.f32 %s1431_s18, %s1332_s27 }
 0x693   :  { %v360_v31 = vstv %s359_s28 }
 0x694   :  { %1370 = vrcp.f32 %v360_v31 }
 0x6a1   :  { %v1371_v32 = vpop.eup %1370 }
 0x6a2   :  { %1333 = vpush %v1371_v32 }
 0x6d3   :  { %s1334_s29 = spop %1333 }
 0x6d4   :  { %v363_v33 = vstv %s1334_s29 }
 0x6d5   :  { %v364_v34 = vmul.f32 %v363_v33, %v344_v3 }
 0x6d7   :  { %365 = vst [vmem:[#allocation5 + $0x2] sm:$0x1] %v364_v34  ;;  %1175 = vmatmul.mubr.f32.vlgmr.msra.gmra.mxu1 %v364_v34 }
 0x6d8   :  { %1213 = vmatpush3.xpose.msra.mxu1 %v1459_v7  ;;  %1244 = vmatprep.mubr.msk.f32.mxu1 %vm1430_vm1, %v1429_v9 }
 0x6d9   :  { %1214 = vmatprep.subr.mxu1 %v1429_v9 }
 0x6dc   :  { %1215 = vmatpush3.xpose.msra.mxu1 %v1466_v11 }
 0x6dd   :  { %1216 = vmatprep.subr.mxu1 %v1429_v9 }
 0x6e0   :  { %1217 = vmatpush3.xpose.msra.mxu1 %v1472_v13 }
 0x6e1   :  { %1218 = vmatprep.subr.mxu1 %v1429_v9 }
 0x6e4   :  { %1219 = vmatpush3.xpose.msra.mxu1 %v1479_v14 }
 0x6e5   :  { %1220 = vmatprep.subr.mxu1 %v1429_v9 }
 0x6e8   :  { %1221 = vmatpush3.xpose.msra.mxu1 %v1484_v15 }
 0x6e9   :  { %1222 = vmatprep.subr.mxu1 %v1429_v9 }
 0x6ec   :  { %1223 = vmatpush3.xpose.msra.mxu1 %v1490_v16 }
 0x6ed   :  { %1224 = vmatprep.subr.mxu1 %v1429_v9 }
 0x6f0   :  { %1225 = vmatpush3.xpose.msra.mxu1 %v1496_v17 }
 0x6f1   :  { %1226 = vmatprep.subr.mxu1 %v1429_v9 }
 0x6f4   :  { %1227 = vmatpush3.xpose.msra.mxu1 %v1502_v18 }
 0x6f5   :  { %1228 = vmatprep.subr.mxu1 %v1429_v9 }
 0x6f8   :  { %1229 = vmatpush3.xpose.msra.mxu1 %v1508_v19 }
 0x6f9   :  { %1230 = vmatprep.subr.mxu1 %v1429_v9 }
 0x6fc   :  { %1231 = vmatpush3.xpose.msra.mxu1 %v1514_v20 }
 0x6fd   :  { %1232 = vmatprep.subr.mxu1 %v1429_v9 }
 0x700   :  { %1233 = vmatpush3.xpose.msra.mxu1 %v1520_v21 }
 0x701   :  { %1234 = vmatprep.subr.mxu1 %v1429_v9 }
 0x704   :  { %1235 = vmatpush3.xpose.msra.mxu1 %v1526_v22 }
 0x705   :  { %1236 = vmatprep.subr.mxu1 %v1429_v9 }
 0x708   :  { %1237 = vmatpush3.xpose.msra.mxu1 %v1532_v23 }
 0x709   :  { %1238 = vmatprep.subr.mxu1 %v1429_v9 }
 0x70c   :  { %1239 = vmatpush3.xpose.msra.mxu1 %v1538_v24 }
 0x70d   :  { %1240 = vmatprep.subr.mxu1 %v1429_v9 }
 0x710   :  { %1241 = vmatpush3.xpose.msra.mxu1 %v1544_v25 }
 0x711   :  { %1242 = vmatprep.subr.mxu1 %v1429_v9 }
 0x714   :  { %1243 = vmatpush3.xpose.msra.mxu1 %v1551_v27 }
 0x715   :  { %1282 = vmatprep.subr.mxu1 %v1429_v9 }
 0x797   :  { %v448_v35 = vpop.f32.mrf.mxu1 }
 0x798   :  { %v452_v36 = vand.u32 2147483647, %v448_v35 }
 0x799   :  { %v1176_v37 = vpop.f32.mrf.mxu1 }
 0x79a   :  { %v453_v38 = vsel %vm28_vm0, %v452_v36, -inf }
 0x79b   :  { %454 = vmax.xlane.f32.xlu0 %v453_v38 }
 0x824   :  { %v455_v39 = vpop.xlane.xlu0 %454 }
 0x825   :  { %v456_v40 = vrot.slane %v455_v39, 4 }
 0x827   :  { %v457_v41 = vmax.f32 %v455_v39, %v456_v40 }
 0x829   :  { %v458_v42 = vrot.slane %v457_v41, 2 }
 0x82b   :  { %v459_v43 = vmax.f32 %v457_v41, %v458_v42 }
 0x82d   :  { %v460_v44 = vrot.slane %v459_v43, 1 }
 0x82f   :  { %v461_v45 = vmax.f32 %v459_v43, %v460_v44 }
 0x831   :  { %1335 = vpush %v461_v45 }
 0x862   :  { %s1336_s30 = spop %1335 }
 0x863   :  { %s463_s3 = smax.f32 %s1431_s18, %s1336_s30 }
 0x864   :  { %v464_v46 = vstv %s463_s3 }
 0x865   :  { %1372 = vrcp.f32 %v464_v46 }
 0x872   :  { %v1373_v47 = vpop.eup %1372 }
 0x873   :  { %1337 = vpush %v1373_v47 }
 0x8a4   :  { %s1338_s4 = spop %1337 }
 0x8a5   :  { %v467_v48 = vstv %s1338_s4 }
 0x8a6   :  { %v468_v49 = vmul.f32 %v467_v48, %v448_v35 }
 0x8a8   :  { %469 = vst [vmem:[#allocation5 + $0x3] sm:$0x1] %v468_v49  ;;  %1210 = vmatmul.mubr.f32.vlgmr.msra.gmra.mxu0 %v468_v49 }
 0x8a9   :  { %1248 = vmatpush3.xpose.msra.mxu0 %v1459_v7  ;;  %1279 = vmatprep.mubr.msk.f32.mxu0 %vm1430_vm1, %v1429_v9 }
 0x8aa   :  { %1249 = vmatprep.subr.mxu0 %v1429_v9 }
 0x8ad   :  { %1250 = vmatpush3.xpose.msra.mxu0 %v1466_v11 }
 0x8ae   :  { %1251 = vmatprep.subr.mxu0 %v1429_v9 }
 0x8b1   :  { %1252 = vmatpush3.xpose.msra.mxu0 %v1472_v13 }
 0x8b2   :  { %1253 = vmatprep.subr.mxu0 %v1429_v9 }
 0x8b5   :  { %1254 = vmatpush3.xpose.msra.mxu0 %v1479_v14 }
 0x8b6   :  { %1255 = vmatprep.subr.mxu0 %v1429_v9 }
 0x8b9   :  { %1256 = vmatpush3.xpose.msra.mxu0 %v1484_v15 }
 0x8ba   :  { %1257 = vmatprep.subr.mxu0 %v1429_v9 }
 0x8bd   :  { %1258 = vmatpush3.xpose.msra.mxu0 %v1490_v16 }
 0x8be   :  { %1259 = vmatprep.subr.mxu0 %v1429_v9 }
 0x8c1   :  { %1260 = vmatpush3.xpose.msra.mxu0 %v1496_v17 }
 0x8c2   :  { %1261 = vmatprep.subr.mxu0 %v1429_v9 }
 0x8c5   :  { %1262 = vmatpush3.xpose.msra.mxu0 %v1502_v18 }
 0x8c6   :  { %1263 = vmatprep.subr.mxu0 %v1429_v9 }
 0x8c9   :  { %1264 = vmatpush3.xpose.msra.mxu0 %v1508_v19 }
 0x8ca   :  { %1265 = vmatprep.subr.mxu0 %v1429_v9 }
 0x8cd   :  { %1266 = vmatpush3.xpose.msra.mxu0 %v1514_v20 }
 0x8ce   :  { %1267 = vmatprep.subr.mxu0 %v1429_v9 }
 0x8d1   :  { %1268 = vmatpush3.xpose.msra.mxu0 %v1520_v21 }
 0x8d2   :  { %1269 = vmatprep.subr.mxu0 %v1429_v9 }
 0x8d5   :  { %1270 = vmatpush3.xpose.msra.mxu0 %v1526_v22 }
 0x8d6   :  { %1271 = vmatprep.subr.mxu0 %v1429_v9 }
 0x8d9   :  { %1272 = vmatpush3.xpose.msra.mxu0 %v1532_v23 }
 0x8da   :  { %1273 = vmatprep.subr.mxu0 %v1429_v9 }
 0x8dd   :  { %1274 = vmatpush3.xpose.msra.mxu0 %v1538_v24 }
 0x8de   :  { %1275 = vmatprep.subr.mxu0 %v1429_v9 }
 0x8e1   :  { %1276 = vmatpush3.xpose.msra.mxu0 %v1544_v25 }
 0x8e2   :  { %1277 = vmatprep.subr.mxu0 %v1429_v9 }
 0x8e5   :  { %1278 = vmatpush3.xpose.msra.mxu0 %v1551_v27 }
 0x968   :  { %v552_v50 = vpop.f32.mrf.mxu0 }
 0x969   :  { %v556_v51 = vand.u32 2147483647, %v552_v50 }
 0x96a   :  { %v1211_v52 = vpop.f32.mrf.mxu0 }
 0x96b   :  { %v557_v53 = vsel %vm28_vm0, %v556_v51, -inf }
 0x96c   :  { %558 = vmax.xlane.f32.xlu1 %v557_v53 }
 0x9f5   :  { %v559_v54 = vpop.xlane.xlu1 %558 }
 0x9f6   :  { %v560_v55 = vrot.slane %v559_v54, 4 }
 0x9f8   :  { %v561_v56 = vmax.f32 %v559_v54, %v560_v55 }
 0x9fa   :  { %v562_v57 = vrot.slane %v561_v56, 2 }
 0x9fc   :  { %v563_v58 = vmax.f32 %v561_v56, %v562_v57 }
 0x9fe   :  { %v564_v59 = vrot.slane %v563_v58, 1 }
 0xa00   :  { %v565_v60 = vmax.f32 %v563_v58, %v564_v59 }
 0xa02   :  { %1339 = vpush %v565_v60 }
 0xa33   :  { %s1340_s5 = spop %1339 }
 0xa34   :  { %s567_s6 = smax.f32 %s1431_s18, %s1340_s5 }
 0xa35   :  { %v568_v61 = vstv %s567_s6 }
 0xa36   :  { %1374 = vrcp.f32 %v568_v61 }
 0xa43   :  { %v1375_v62 = vpop.eup %1374 }
 0xa44   :  { %1341 = vpush %v1375_v62 }
 0xa75   :  { %s1342_s7 = spop %1341 }
 0xa76   :  { %v571_v63 = vstv %s1342_s7 }
 0xa77   :  { %v572_v0 = vmul.f32 %v571_v63, %v552_v50 }
 0xa79   :  { %573 = vst [vmem:[#allocation5 + $0x4] sm:$0x1] %v572_v0  ;;  %1245 = vmatmul.mubr.f32.vlgmr.msra.gmra.mxu1 %v572_v0 }
 0xa7a   :  { %1283 = vmatpush3.xpose.msra.mxu1 %v1459_v7  ;;  %1314 = vmatprep.mubr.msk.f32.mxu1 %vm1430_vm1, %v1429_v9 }
 0xa7b   :  { %1284 = vmatprep.subr.mxu1 %v1429_v9 }
 0xa7e   :  { %1285 = vmatpush3.xpose.msra.mxu1 %v1466_v11 }
 0xa7f   :  { %1286 = vmatprep.subr.mxu1 %v1429_v9 }
 0xa82   :  { %1287 = vmatpush3.xpose.msra.mxu1 %v1472_v13 }
 0xa83   :  { %1288 = vmatprep.subr.mxu1 %v1429_v9 }
 0xa86   :  { %1289 = vmatpush3.xpose.msra.mxu1 %v1479_v14 }
 0xa87   :  { %1290 = vmatprep.subr.mxu1 %v1429_v9 }
 0xa8a   :  { %1291 = vmatpush3.xpose.msra.mxu1 %v1484_v15 }
 0xa8b   :  { %1292 = vmatprep.subr.mxu1 %v1429_v9 }
 0xa8e   :  { %1293 = vmatpush3.xpose.msra.mxu1 %v1490_v16 }
 0xa8f   :  { %1294 = vmatprep.subr.mxu1 %v1429_v9 }
 0xa92   :  { %1295 = vmatpush3.xpose.msra.mxu1 %v1496_v17 }
 0xa93   :  { %1296 = vmatprep.subr.mxu1 %v1429_v9 }
 0xa96   :  { %1297 = vmatpush3.xpose.msra.mxu1 %v1502_v18 }
 0xa97   :  { %1298 = vmatprep.subr.mxu1 %v1429_v9 }
 0xa9a   :  { %1299 = vmatpush3.xpose.msra.mxu1 %v1508_v19 }
 0xa9b   :  { %1300 = vmatprep.subr.mxu1 %v1429_v9 }
 0xa9e   :  { %1301 = vmatpush3.xpose.msra.mxu1 %v1514_v20 }
 0xa9f   :  { %1302 = vmatprep.subr.mxu1 %v1429_v9 }
 0xaa2   :  { %1303 = vmatpush3.xpose.msra.mxu1 %v1520_v21 }
 0xaa3   :  { %1304 = vmatprep.subr.mxu1 %v1429_v9 }
 0xaa6   :  { %1305 = vmatpush3.xpose.msra.mxu1 %v1526_v22 }
 0xaa7   :  { %1306 = vmatprep.subr.mxu1 %v1429_v9 }
 0xaaa   :  { %1307 = vmatpush3.xpose.msra.mxu1 %v1532_v23 }
 0xaab   :  { %1308 = vmatprep.subr.mxu1 %v1429_v9 }
 0xaae   :  { %1309 = vmatpush3.xpose.msra.mxu1 %v1538_v24 }
 0xaaf   :  { %1310 = vmatprep.subr.mxu1 %v1429_v9 }
 0xab2   :  { %1311 = vmatpush3.xpose.msra.mxu1 %v1544_v25 }
 0xab3   :  { %1312 = vmatprep.subr.mxu1 %v1429_v9 }
 0xab6   :  { %1313 = vmatpush3.xpose.msra.mxu1 %v1551_v27 }
 0xb39   :  { %v656_v7 = vpop.f32.mrf.mxu1 }
 0xb3a   :  { %v660_v11 = vand.u32 2147483647, %v656_v7 }
 0xb3b   :  { %v1246_v13 = vpop.f32.mrf.mxu1 }
 0xb3c   :  { %v661_v14 = vsel %vm28_vm0, %v660_v11, -inf }
 0xb3d   :  { %662 = vmax.xlane.f32.xlu0 %v661_v14 }
 0xbc6   :  { %v663_v15 = vpop.xlane.xlu0 %662 }
 0xbc7   :  { %v664_v16 = vrot.slane %v663_v15, 4 }
 0xbc9   :  { %v665_v17 = vmax.f32 %v663_v15, %v664_v16 }
 0xbcb   :  { %v666_v18 = vrot.slane %v665_v17, 2 }
 0xbcd   :  { %v667_v19 = vmax.f32 %v665_v17, %v666_v18 }
 0xbcf   :  { %v668_v20 = vrot.slane %v667_v19, 1 }
 0xbd1   :  { %v669_v21 = vmax.f32 %v667_v19, %v668_v20 }
 0xbd3   :  { %1343 = vpush %v669_v21 }
 0xc04   :  { %s1344_s8 = spop %1343 }
 0xc05   :  { %s671_s9 = smax.f32 %s1431_s18, %s1344_s8 }
 0xc06   :  { %v672_v9 = vstv %s671_s9 }
 0xc07   :  { %1376 = vrcp.f32 %v672_v9 }
 0xc14   :  { %v1377_v22 = vpop.eup %1376 }
 0xc15   :  { %1345 = vpush %v1377_v22 }
 0xc46   :  { %s1346_s10 = spop %1345 }
 0xc47   :  { %v675_v23 = vstv %s1346_s10 }
 0xc48   :  { %v676_v24 = vmul.f32 %v675_v23, %v656_v7 }
 0xc4a   :  { %677 = vst [vmem:[#allocation5 + $0x5] sm:$0x1] %v676_v24  ;;  %1280 = vmatmul.mubr.f32.vlgmr.msra.gmra.mxu0 %v676_v24 }
 0xd0a   :  { %v760_v25 = vpop.f32.mrf.mxu0 }
 0xd0b   :  { %v764_v27 = vand.u32 2147483647, %v760_v25 }
 0xd0c   :  { %v1281_v1 = vpop.f32.mrf.mxu0 }
 0xd0d   :  { %v765_v2 = vsel %vm28_vm0, %v764_v27, -inf }
 0xd0e   :  { %766 = vmax.xlane.f32.xlu1 %v765_v2 }
 0xd97   :  { %v767_v3 = vpop.xlane.xlu1 %766 }
 0xd98   :  { %v768_v4 = vrot.slane %v767_v3, 4 }
 0xd9a   :  { %v769_v5 = vmax.f32 %v767_v3, %v768_v4 }
 0xd9c   :  { %v770_v6 = vrot.slane %v769_v5, 2 }
 0xd9e   :  { %v771_v8 = vmax.f32 %v769_v5, %v770_v6 }
 0xda0   :  { %v772_v10 = vrot.slane %v771_v8, 1 }
 0xda2   :  { %v773_v12 = vmax.f32 %v771_v8, %v772_v10 }
 0xda4   :  { %1347 = vpush %v773_v12 }
 0xdd5   :  { %s1348_s11 = spop %1347 }
 0xdd6   :  { %s775_s12 = smax.f32 %s1431_s18, %s1348_s11 }
 0xdd7   :  { %v776_v26 = vstv %s775_s12 }
 0xdd8   :  { %1378 = vrcp.f32 %v776_v26 }
 0xde5   :  { %v1379_v28 = vpop.eup %1378 }
 0xde6   :  { %1349 = vpush %v1379_v28 }
 0xe17   :  { %s1350_s13 = spop %1349 }
 0xe18   :  { %v779_v29 = vstv %s1350_s13 }
 0xe19   :  { %v780_v30 = vmul.f32 %v779_v29, %v760_v25 }
 0xe1b   :  { %781 = vst [vmem:[#allocation5 + $0x6] sm:$0x1] %v780_v30  ;;  %1315 = vmatmul.mubr.f32.vlgmr.msra.gmra.mxu1 %v780_v30 }
 0xedb   :  { %v864_v31 = vpop.f32.mrf.mxu1 }
 0xedc   :  { %v868_v32 = vand.u32 2147483647, %v864_v31 }
 0xedd   :  { %v1316_v33 = vpop.f32.mrf.mxu1 }
 0xede   :  { %v869_v34 = vsel %vm28_vm0, %v868_v32, -inf }
 0xedf   :  { %870 = vmax.xlane.f32.xlu0 %v869_v34 }
 0xf68   :  { %v871_v35 = vpop.xlane.xlu0 %870 }
 0xf69   :  { %v872_v36 = vrot.slane %v871_v35, 4 }
 0xf6b   :  { %v873_v37 = vmax.f32 %v871_v35, %v872_v36 }
 0xf6d   :  { %v874_v38 = vrot.slane %v873_v37, 2 }
 0xf6f   :  { %v875_v39 = vmax.f32 %v873_v37, %v874_v38 }
 0xf71   :  { %v876_v40 = vrot.slane %v875_v39, 1 }
 0xf73   :  { %v877_v41 = vmax.f32 %v875_v39, %v876_v40 }
 0xf75   :  { %1351 = vpush %v877_v41 }
 0xfa6   :  { %s1352_s14 = spop %1351 }
 0xfa7   :  { %s879_s15 = smax.f32 %s1431_s18, %s1352_s14 }
 0xfa8   :  { %v880_v42 = vstv %s879_s15 }
 0xfa9   :  { %1380 = vrcp.f32 %v880_v42 }
 0xfb6   :  { %v1381_v43 = vpop.eup %1380 }
 0xfb7   :  { %1353 = vpush %v1381_v43 }
 0xfe8   :  { %s1354_s0 = spop %1353 }
 0xfe9   :  { %v883_v44 = vstv %s1354_s0 }
 0xfea   :  { %v884_v45 = vmul.f32 %v883_v44, %v864_v31 }
 0xfec   :  { %885 = vst [vmem:[#allocation5 + $0x7] sm:$0x1] %v884_v45 }
 0xfed   :  { %1413 = shalt.err (!%p1410_p9)
}
 0xfee   :  { %895 = dma.vmem_to_hbm [thread:$0]  %s893_s17, 128, %s1786_s2, [#allocation4]  }
 0xfef   :  { %1424 = dma.done.wait [#allocation4], 128  }
 0xff0   :  { %1425 = vsyncadd [#allocation4], 4294967168 }
 0xff1   :  { %899 = vsyncpa [#allocation3], 1 }
 0xff2   :  { %900 = vsyncpa [#allocation4], 1 }

</bundles_post_ra>
